<compile_context>
chip_gen: v7x
topology: tpu7x:2x2x1
jax: 0.10.0
libtpu: 0.0.40
codegen_flags: <defaults>
</compile_context>

<pallas_src>
import jax
import jax.numpy as jnp
from jax.experimental import pallas as pl
from jax.experimental.pallas import tpu as pltpu

SUBLANE = 8
DEFAULT_BLOCK_B = 2048


def _round_up(a, m):
    return (a + m - 1) // m * m


def _verifier_regressor_kernel(x_ref, w1_ref, b1_ref, g_ref, beta_ref,
                               w2_ref, b2_ref, o_ref):
    x = x_ref[...]                                          # [TB, D_in] f32

    # --- Linear 1: [TB, D_in] @ [D_in, H] + [1, H] (f32 MXU accumulate) ---
    h = jnp.dot(x, w1_ref[...], preferred_element_type=jnp.float32) + b1_ref[...]

    # --- LayerNorm over last dim (two-pass variance, biased, eps=1e-5) ---
    inv_h = 1.0 / h.shape[-1]
    mean = jnp.sum(h, axis=-1, keepdims=True) * inv_h
    centered = h - mean
    var = jnp.sum(centered * centered, axis=-1, keepdims=True) * inv_h
    h_norm = centered * jax.lax.rsqrt(var + 1e-5)
    h_norm = h_norm * g_ref[...] + beta_ref[...]

    # --- ReLU ---
    h_act = jnp.maximum(h_norm, 0.0)

    # --- Linear 2 (output columns zero-padded to a multiple of 8 lanes) ---
    out = jnp.dot(h_act, w2_ref[...], preferred_element_type=jnp.float32) + b2_ref[...]
    o_ref[...] = out.astype(o_ref.dtype)


def verifier_regressor(x, w1, b1, gamma, beta, w2, b2, *, block_b=DEFAULT_BLOCK_B):
    """x: [B, D_in] f32. Returns [B, D_out] f32."""
    B, d_in = x.shape
    hidden = w1.shape[1]
    d_out = w2.shape[1]

    # Batch tile: multiple of 8 sublanes, capped at block_b, and also capped
    # near ceil(B/2) so large batches still yield >= 2 parallel grid steps
    # (lets v7x megacore split the batch across its two TensorCores).
    half = _round_up(pl.cdiv(B, 2), SUBLANE)
    tb = max(SUBLANE, min(block_b, half))
    grid = (pl.cdiv(B, tb),)          # ragged tail handled by Pallas (row-wise op)

    # Narrow output padding: round D_out up to the sublane multiple (8).
    out_pad = _round_up(d_out, SUBLANE)
    w2p = jnp.pad(w2, ((0, 0), (0, out_pad - d_out)))
    b2p = jnp.pad(b2, ((0, 0), (0, out_pad - d_out)))

    const2d = lambda i: (0, 0)        # weights/biases: same block every grid step

    out = pl.pallas_call(
        _verifier_regressor_kernel,
        out_shape=jax.ShapeDtypeStruct((B, out_pad), jnp.float32),
        grid=grid,
        in_specs=[
            pl.BlockSpec((tb, d_in), lambda i: (i, 0)),   # x      (tiled over batch)
            pl.BlockSpec((d_in, hidden), const2d),        # w1     (VMEM-resident)
            pl.BlockSpec((1, hidden), const2d),           # b1
            pl.BlockSpec((1, hidden), const2d),           # gamma
            pl.BlockSpec((1, hidden), const2d),           # beta
            pl.BlockSpec((hidden, out_pad), const2d),     # w2 (padded to 8-mult cols)
            pl.BlockSpec((1, out_pad), const2d),          # b2 (padded to 8-mult cols)
        ],
        out_specs=pl.BlockSpec((tb, out_pad), lambda i: (i, 0)),
        compiler_params=pltpu.CompilerParams(
            dimension_semantics=("parallel",)),
    )(x, w1, b1, gamma, beta, w2p, b2p)

    # Slice off only the small lane padding of the output dim.
    return out[:, :d_out]


def init_params(key, input_dim, hidden_dim=64, output_dim=3):
    """Deterministic synthetic parameters (matching the nn.Module's shapes)."""
    k1, k2, k3, k4 = jax.random.split(key, 4)
    w1 = jax.random.normal(k1, (input_dim, hidden_dim), jnp.float32) * 0.1
    b1 = jax.random.normal(k2, (1, hidden_dim), jnp.float32) * 0.01
    gamma = jnp.ones((1, hidden_dim), jnp.float32)
    beta = jnp.zeros((1, hidden_dim), jnp.float32)
    w2 = jax.random.normal(k3, (hidden_dim, output_dim), jnp.float32) * 0.1
    b2 = jax.random.normal(k4, (1, output_dim), jnp.float32) * 0.01
    return w1, b1, gamma, beta, w2, b2


def reference_forward(x, w1, b1, gamma, beta, w2, b2):
    """Pure-JAX reference for sanity checking."""
    h = x @ w1 + b1
    mean = jnp.mean(h, axis=-1, keepdims=True)
    var = jnp.mean((h - mean) ** 2, axis=-1, keepdims=True)
    h = (h - mean) / jnp.sqrt(var + 1e-5) * gamma + beta
    h = jnp.maximum(h, 0.0)
    return h @ w2 + b2


if __name__ == "__main__":
    batch = 10          # not a multiple of 8: exercises the ragged tail + 2 grid steps
    input_dim = 32
    hidden_dim = 64
    output_dim = 3

    key = jax.random.PRNGKey(0)
    kx, kp = jax.random.split(key)
    x = jax.random.normal(kx, (batch, input_dim), jnp.float32)
    params = init_params(kp, input_dim, hidden_dim, output_dim)

    out = verifier_regressor(x, *params)
    out = jax.block_until_ready(out)

    ref = reference_forward(x, *params)
    assert out.shape == (batch, output_dim)
    assert jnp.allclose(out, ref, atol=1e-4, rtol=1e-4)

    print("KERNEL_OK")
</pallas_src>

<mosaic_0001>
module attributes {stable_mosaic.version = 11 : i64} {
  func.func @_verifier_regressor_kernel(%arg0: i32, %arg1: memref<8x32xf32, #tpu.memory_space<vmem>>, %arg2: memref<32x64xf32, #tpu.memory_space<vmem>>, %arg3: memref<1x64xf32, #tpu.memory_space<vmem>>, %arg4: memref<1x64xf32, #tpu.memory_space<vmem>>, %arg5: memref<1x64xf32, #tpu.memory_space<vmem>>, %arg6: memref<64x8xf32, #tpu.memory_space<vmem>>, %arg7: memref<1x8xf32, #tpu.memory_space<vmem>>, %arg8: memref<8x8xf32, #tpu.memory_space<vmem>>) attributes {dimension_semantics = [#tpu.dimension_semantics<parallel>], iteration_bounds = array<i64: 2>, scalar_prefetch = 0 : i64, scratch_operands = 0 : i64, tpu.core_type = #tpu.core_type<tc>, window_params = [{transform_indices = @transform_0, window_bounds = array<i64: 8, 32>}, {pipeline_mode = #tpu.pipeline_mode<synchronous>, transform_indices = @transform_1, window_bounds = array<i64: 32, 64>}, {pipeline_mode = #tpu.pipeline_mode<synchronous>, transform_indices = @transform_2, window_bounds = array<i64: 1, 64>}, {pipeline_mode = #tpu.pipeline_mode<synchronous>, transform_indices = @transform_3, window_bounds = array<i64: 1, 64>}, {pipeline_mode = #tpu.pipeline_mode<synchronous>, transform_indices = @transform_4, window_bounds = array<i64: 1, 64>}, {pipeline_mode = #tpu.pipeline_mode<synchronous>, transform_indices = @transform_5, window_bounds = array<i64: 64, 8>}, {pipeline_mode = #tpu.pipeline_mode<synchronous>, transform_indices = @transform_6, window_bounds = array<i64: 1, 8>}, {transform_indices = @transform_7, window_bounds = array<i64: 8, 8>}]} {
    %c0 = arith.constant 0 : index
    %c0_0 = arith.constant 0 : index
    %0 = vector.load %arg1[%c0, %c0_0] : memref<8x32xf32, #tpu.memory_space<vmem>>, vector<8x32xf32>
    %c0_1 = arith.constant 0 : index
    %c0_2 = arith.constant 0 : index
    %1 = vector.load %arg2[%c0_1, %c0_2] : memref<32x64xf32, #tpu.memory_space<vmem>>, vector<32x64xf32>
    %cst = arith.constant dense<0.000000e+00> : vector<8x64xf32>
    %2 = tpu.matmul %0, %1, %cst {dimension_numbers = #tpu.dot_dimension_numbers<[1], [0], [0], [1], [0, 0, 1, 1], [], []>} : vector<8x32xf32>, vector<32x64xf32>, vector<8x64xf32> -> vector<8x64xf32>
    %c0_3 = arith.constant 0 : index
    %c0_4 = arith.constant 0 : index
    %3 = vector.load %arg3[%c0_3, %c0_4] : memref<1x64xf32, #tpu.memory_space<vmem>>, vector<1x64xf32>
    %4 = vector.broadcast %3 : vector<1x64xf32> to vector<8x64xf32>
    %5 = arith.addf %2, %4 : vector<8x64xf32>
    %cst_5 = arith.constant dense<0.000000e+00> : vector<8xf32>
    %6 = vector.multi_reduction <add>, %5, %cst_5 [1] : vector<8x64xf32> to vector<8xf32>
    %7 = vector.shape_cast %6 : vector<8xf32> to vector<8x1xf32>
    %cst_6 = arith.constant 1.562500e-02 : f32
    %8 = vector.broadcast %cst_6 : f32 to vector<8x1xf32>
    %9 = arith.mulf %7, %8 : vector<8x1xf32>
    %10 = vector.broadcast %9 : vector<8x1xf32> to vector<8x64xf32>
    %11 = arith.subf %5, %10 : vector<8x64xf32>
    %12 = arith.mulf %11, %11 : vector<8x64xf32>
    %cst_7 = arith.constant dense<0.000000e+00> : vector<8xf32>
    %13 = vector.multi_reduction <add>, %12, %cst_7 [1] : vector<8x64xf32> to vector<8xf32>
    %14 = vector.shape_cast %13 : vector<8xf32> to vector<8x1xf32>
    %cst_8 = arith.constant 1.562500e-02 : f32
    %15 = vector.broadcast %cst_8 : f32 to vector<8x1xf32>
    %16 = arith.mulf %14, %15 : vector<8x1xf32>
    %cst_9 = arith.constant 9.99999974E-6 : f32
    %17 = vector.broadcast %cst_9 : f32 to vector<8x1xf32>
    %18 = arith.addf %16, %17 : vector<8x1xf32>
    %19 = math.rsqrt %18 : vector<8x1xf32>
    %20 = vector.broadcast %19 : vector<8x1xf32> to vector<8x64xf32>
    %21 = arith.mulf %11, %20 : vector<8x64xf32>
    %c0_10 = arith.constant 0 : index
    %c0_11 = arith.constant 0 : index
    %22 = vector.load %arg4[%c0_10, %c0_11] : memref<1x64xf32, #tpu.memory_space<vmem>>, vector<1x64xf32>
    %23 = vector.broadcast %22 : vector<1x64xf32> to vector<8x64xf32>
    %24 = arith.mulf %21, %23 : vector<8x64xf32>
    %c0_12 = arith.constant 0 : index
    %c0_13 = arith.constant 0 : index
    %25 = vector.load %arg5[%c0_12, %c0_13] : memref<1x64xf32, #tpu.memory_space<vmem>>, vector<1x64xf32>
    %26 = vector.broadcast %25 : vector<1x64xf32> to vector<8x64xf32>
    %27 = arith.addf %24, %26 : vector<8x64xf32>
    %cst_14 = arith.constant 0.000000e+00 : f32
    %28 = vector.broadcast %cst_14 : f32 to vector<8x64xf32>
    %29 = arith.maximumf %27, %28 : vector<8x64xf32>
    %c0_15 = arith.constant 0 : index
    %c0_16 = arith.constant 0 : index
    %30 = vector.load %arg6[%c0_15, %c0_16] : memref<64x8xf32, #tpu.memory_space<vmem>>, vector<64x8xf32>
    %cst_17 = arith.constant dense<0.000000e+00> : vector<8x8xf32>
    %31 = tpu.matmul %29, %30, %cst_17 {dimension_numbers = #tpu.dot_dimension_numbers<[1], [0], [0], [1], [0, 0, 1, 1], [], []>} : vector<8x64xf32>, vector<64x8xf32>, vector<8x8xf32> -> vector<8x8xf32>
    %c0_18 = arith.constant 0 : index
    %c0_19 = arith.constant 0 : index
    %32 = vector.load %arg7[%c0_18, %c0_19] : memref<1x8xf32, #tpu.memory_space<vmem>>, vector<1x8xf32>
    %33 = vector.broadcast %32 : vector<1x8xf32> to vector<8x8xf32>
    %34 = arith.addf %31, %33 : vector<8x8xf32>
    %c0_20 = arith.constant 0 : index
    %c0_21 = arith.constant 0 : index
    %35 = vector.load %arg8[%c0_20, %c0_21] : memref<8x8xf32, #tpu.memory_space<vmem>>, vector<8x8xf32>
    tpu.vector_store %arg8[%c0_20, %c0_21], %34 {strides = array<i32>} : memref<8x8xf32, #tpu.memory_space<vmem>>, vector<8x8xf32>,
    return
  }
  func.func @transform_0(%arg0: i32) -> (i32, i32) {
    %c0_i32 = arith.constant 0 : i32
    %c0_i32_0 = arith.constant 0 : i32
    return %arg0, %c0_i32 : i32, i32
  }
  func.func @transform_1(%arg0: i32) -> (i32, i32) {
    %c0_i32 = arith.constant 0 : i32
    %c0_i32_0 = arith.constant 0 : i32
    %c0_i32_1 = arith.constant 0 : i32
    return %c0_i32, %c0_i32_0 : i32, i32
  }
  func.func @transform_2(%arg0: i32) -> (i32, i32) {
    %c0_i32 = arith.constant 0 : i32
    %c0_i32_0 = arith.constant 0 : i32
    %c0_i32_1 = arith.constant 0 : i32
    return %c0_i32, %c0_i32_0 : i32, i32
  }
  func.func @transform_3(%arg0: i32) -> (i32, i32) {
    %c0_i32 = arith.constant 0 : i32
    %c0_i32_0 = arith.constant 0 : i32
    %c0_i32_1 = arith.constant 0 : i32
    return %c0_i32, %c0_i32_0 : i32, i32
  }
  func.func @transform_4(%arg0: i32) -> (i32, i32) {
    %c0_i32 = arith.constant 0 : i32
    %c0_i32_0 = arith.constant 0 : i32
    %c0_i32_1 = arith.constant 0 : i32
    return %c0_i32, %c0_i32_0 : i32, i32
  }
  func.func @transform_5(%arg0: i32) -> (i32, i32) {
    %c0_i32 = arith.constant 0 : i32
    %c0_i32_0 = arith.constant 0 : i32
    %c0_i32_1 = arith.constant 0 : i32
    return %c0_i32, %c0_i32_0 : i32, i32
  }
  func.func @transform_6(%arg0: i32) -> (i32, i32) {
    %c0_i32 = arith.constant 0 : i32
    %c0_i32_0 = arith.constant 0 : i32
    %c0_i32_1 = arith.constant 0 : i32
    return %c0_i32, %c0_i32_0 : i32, i32
  }
  func.func @transform_7(%arg0: i32) -> (i32, i32) {
    %c0_i32 = arith.constant 0 : i32
    %c0_i32_0 = arith.constant 0 : i32
    return %arg0, %c0_i32 : i32, i32
  }
}

</mosaic_0001>

<bundles_post_ra>
// kernel: tpu_custom_call.1
= control target key start
LH: loop header
LB: loop body
LE: loop exit
PB: predicated region body
PF: predicated region fallthrough
CT: control target
= control target key end

     0   :  { %s675_s24 = smov 0   ;;  %s750_s0 = inlined_call_operand.vmem [shape: f32[10,32], index: 0, kind: input, shape index: {}]   ;;  %s751_s1 = inlined_call_operand.vmem [shape: f32[32,64], index: 1, kind: input, shape index: {}]   ;;  %s752_s2 = inlined_call_operand.vmem [shape: f32[1,64], index: 2, kind: input, shape index: {}]   ;;  %s753_s3 = inlined_call_operand.vmem [shape: f32[1,64], index: 3, kind: input, shape index: {}]   ;;  %s754_s4 = inlined_call_operand.vmem [shape: f32[1,64], index: 4, kind: input, shape index: {}]   ;;  %s755_s5 = inlined_call_operand.vmem [shape: f32[64,8], index: 5, kind: input, shape index: {}]   ;;  %s756_s6 = inlined_call_operand.vmem [shape: f32[1,8], index: 6, kind: input, shape index: {}]   ;;  %s757_s7 = inlined_call_operand.vmem [shape: f32[10,8], index: 7, kind: output, shape index: {}]  }
   0x1 LB: > { %s534_s25 = sadd.s32 4294967295, %s630_s24   ;;  %p538_p0 = scmp.ge.s32.totalorder %s630_s24, 1  ;;  %s630_s24 = sphi %s675_s24, %s17_s24  }
   0x2   : > { %p236_p1 = scmp.lt.s32.totalorder %s630_s24, 3 }
   0x4   : > { %p237_p2 = pnand %p538_p0, %p236_p1 }
   0x5   : > { %v275_v0 = vld [vmem:[%s751_s1] sm:$0xff] (!%p237_p2)  ;;  %v276_v1 = vld [vmem:[%s751_s1 + $0x8] sm:$0xff] (!%p237_p2)  ;;  %v277_v2 = vld [vmem:[%s751_s1 + $0x10] sm:$0xff] (!%p237_p2)  ;;  %v632_v3 = vmov (!%p237_p2), 0.0|0.0   ;;  %vm633_vm0 = vmmov (!%p237_p2), 0   ;;  %v634_v6 = vmov (!%p237_p2), 0.0  }
   0x6   : > { %240 = sbr.rel (%p237_p2) target bundleno = 761 (0x2f9), region = 48  ;;  %593 = vmatprep.subr.bf16.mxu0 (!%p237_p2), %v632_v3  ;;  %v594_v4 = vpack.c.bf16 (!%p237_p2), %v276_v1, %v275_v0  ;;  %v278_v5 = vld [vmem:[%s751_s1 + $0x18] sm:$0xff] (!%p237_p2)  ;;  %571 = vmatprep.mubr.msk.f32.mxu0 (!%p237_p2), %vm633_vm0, %v634_v6  ;;  %p266_p3 = scmp.lt.s32.totalorder (!%p237_p2), %s534_s25, 1  ;;  %vm286_vm1 = vcmask (!%p237_p2), 261120   ;;  %v541_v9 = vld [vmem:[%s752_s2] ss:$0 sm:$0xff] (!%p237_p2) }
   0x7   : > { %599 = vmatprep.subr.bf16.mxu1 (!%p237_p2), %v632_v3  ;;  %590 = vmatprep.mubr.msk.f32.mxu1 (!%p237_p2), %vm633_vm0, %v634_v6  ;;  %v597_v7 = vpack.c.bf16 (!%p237_p2), %v278_v5, %v277_v2  ;;  %vm360_vm2 = vcmask (!%p237_p2), 523264   ;;  %v391_v19 = vld [vmem:[%s755_s5] sm:$0xff] (!%p237_p2)  ;;  %v392_v20 = vld [vmem:[%s755_s5 + $0x8] sm:$0xff] (!%p237_p2)  ;;  %v393_v22 = vld [vmem:[%s755_s5 + $0x10] sm:$0xff] (!%p237_p2)  ;;  %vm479_vm3 = vcmask (!%p237_p2), 64512  }
   0x8   : > { %595 = vmatpush3.bf16.msra.mxu0 (!%p237_p2), %v594_v4  ;;  %v600_v21 = vpack.c.bf16 (!%p237_p2), %v392_v20, %v391_v19  ;;  %v394_v23 = vld [vmem:[%s755_s5 + $0x18] sm:$0xff] (!%p237_p2)  ;;  %v395_v25 = vld [vmem:[%s755_s5 + $0x20] sm:$0xff] (!%p237_p2)  ;;  %v396_v26 = vld [vmem:[%s755_s5 + $0x28] sm:$0xff] (!%p237_p2) }
   0x9   : > { %596 = vmatprep.subr.bf16.mxu0 (!%p237_p2), %v632_v3  ;;  %v603_v24 = vpack.c.bf16 (!%p237_p2), %v394_v23, %v393_v22  ;;  %v606_v27 = vpack.c.bf16 (!%p237_p2), %v396_v26, %v395_v25  ;;  %v397_v28 = vld [vmem:[%s755_s5 + $0x30] sm:$0xff] (!%p237_p2)  ;;  %v398_v29 = vld [vmem:[%s755_s5 + $0x38] sm:$0xff] (!%p237_p2)  ;;  %v543_v35 = vld [vmem:[%s753_s3] ss:$0 sm:$0xff] (!%p237_p2) }
   0xa   : > { %601 = vmatpush3.bf16.msra.mxu1 (!%p237_p2), %v600_v21  ;;  %v609_v30 = vpack.c.bf16 (!%p237_p2), %v398_v29, %v397_v28  ;;  %v544_v37 = vld [vmem:[%s754_s4] ss:$0 sm:$0xff] (!%p237_p2) }
   0xb   : > { %602 = vmatprep.subr.bf16.mxu1 (!%p237_p2), %v632_v3  ;;  %v545_v41 = vld [vmem:[%s756_s6] ss:$0 sm:$0xff] (!%p237_p2) }
   0xc   : > { %598 = vmatpush3.bf16.msra.mxu0 (!%p237_p2), %v597_v7 }
   0xd   : > { %s759_s25 = smov (!%p266_p3, %s534_s25), 1 }
   0xe   : > { %s539_s11 = sshll.u32 %s759_s25, 3  ;;  %604 = vmatpush3.bf16.msra.mxu1 %v603_v24 }
   0xf   : > { %s269_s14 = scalar_lea.vmem %s750_s0, %s539_s11  ;;  %605 = vmatprep.subr.bf16.mxu1 %v632_v3  ;;  %s273_s21 = scalar_lea.vmem %s757_s7, %s539_s11 }
  0x10   : > { %v274_v8 = vld [vmem:[%s269_s14] sm:$0xff] }
  0x11   : > { %572 = vmatmul.mubr.msk.f32.vlgmr.msra.gmra.mrb[0].mxu0 %vm286_vm1, %v274_v8 }
  0x12   : > { %607 = vmatpush3.bf16.msra.mxu1 %v606_v27 }
  0x13   : > { %608 = vmatprep.subr.bf16.mxu1 %v632_v3 }
  0x16   : > { %610 = vmatpush3.bf16.msra.mxu1 %v609_v30 }
  0xe4   : > { %v356_v10 = vpop.f32.mrb[0].mxu0 }
  0xe5   : > { %v357_v11 = vadd.f32 %v541_v9, %v356_v10  ;;  %v573_v12 = vpop.f32.mrb[1].mxu0 }
  0xe7   : > { %v361_v13 = vsel %vm360_vm2, %v357_v11, 0.0 }
  0xe8   : > { %362 = vadd.xlane.f32.xlu0 %v361_v13 }
 0x175   : > { %v363_v14 = vpop.xlane.xlu0 %362 }
 0x176   : > { %v364_v15 = vmul.f32 0.015625, %v363_v14 }
 0x178   : > { %v365_v16 = vsub.f32 %v357_v11, %v364_v15 }
 0x17a   : > { %v366_v17 = vmul.f32 %v365_v16, %v365_v16 }
 0x17c   : > { %v367_v18 = vsel %vm360_vm2, %v366_v17, 0.0 }
 0x17d   : > { %368 = vadd.xlane.f32.xlu0 %v367_v18 }
 0x20a   : > { %v369_v31 = vpop.xlane.xlu0 %368 }
 0x20b   : > { %v370_v32 = vmul.f32 0.015625, %v369_v31 }
 0x20d   : > { %v371_v33 = vadd.f32 1e-05, %v370_v32 }
 0x20f   : > { %622 = vrsqrt.f32 %v371_v33 }
 0x219   : > { %v623_v34 = vpop.eup %622 }
 0x21a   : > { %v373_v36 = vmul.f32 %v623_v34, %v365_v16 }
 0x21c   : > { %v381_v38 = vmul.f32 %v543_v35, %v373_v36 }
 0x21e   : > { %v389_v39 = vadd.f32 %v544_v37, %v381_v38 }
 0x220   : > { %v390_v40 = vmax.f32 %v389_v39, 0.0 }
 0x222   : > { %591 = vmatmul.mubr.msk.f32.vlgmr.msra.gmra.mrb[0].mxu1 %vm360_vm2, %v390_v40 }
 0x2f5   : > { %v475_v42 = vpop.f32.mrb[0].mxu1 }
 0x2f6   : > { %v476_v43 = vadd.f32 %v545_v41, %v475_v42  ;;  %v592_v44 = vpop.f32.mrb[1].mxu1 }
 0x2f8   : > { %480 = vst.msk [vmem:[%s273_s21] sm:$0xff] %vm479_vm3, %v476_v43 }
 0x2f9 PF: > { %s17_s24 = sadd.s32 1, %s630_s24  }
 0x2fa   : > { %p14_p4 = scmp.ge.s32.totalorder %s17_s24, 4  }
 0x2fc   :  { %16 = sbr.rel (!%p14_p4) target bundleno = 1 (0x1), region = 78 }

</bundles_post_ra>
